<compile_context>
chip_gen: v6e
topology: v6e:2x2x1
jax: 0.10.0
libtpu: 0.0.40
codegen_flags: <defaults>
</compile_context>

<pallas_src>
import math

import jax
import jax.numpy as jnp
from jax.experimental import pallas as pl
from jax.experimental.pallas import tpu as pltpu


def _make_fb_kernel(K, H, W, C, B, pad):
    """Fused FB forward for one block of B images in flattened-spatial layout.

    Refs:
      x_ref    : (B*C, S)              input rows ordered [b, c]; S = H*W on lanes
      w1_ref   : (B*C, K*K*B*C)        conv1 weights, block-diag over b, cols [t, b, c_in]
      w2_ref   : (B*C, K*K*B*C)        conv2 weights, same layout
      mask_ref : (K, S)                horizontal validity masks per kw (0/1 f32)
      out_ref  : (B*C, S)
      xe_ref   : (B*C, pad + S + pad)  VMEM scratch: per-row zero-padded images
      col_ref  : (K*K*B*C, S)          VMEM scratch: im2col operand
    """
    S = H * W
    p = K // 2
    KK = K * K
    BC = B * C

    def kernel(x_ref, w1_ref, w2_ref, mask_ref, out_ref, xe_ref, col_ref):
        # Zero only the two lane-aligned pad strips; the interior [pad:pad+S] is fully
        # overwritten before every use.  Unconditional -> correct under any grid split.
        xe_ref[:, :pad] = jnp.zeros((BC, pad), jnp.float32)
        xe_ref[:, pad + S:] = jnp.zeros((BC, pad), jnp.float32)

        x = x_ref[...].astype(jnp.float32)                    # (BC, S), lane-dense

        # Hoisted per-kw horizontal wrap-kill masks, each (1, S).
        hmask = [mask_ref[kw:kw + 1, :] for kw in range(K)]

        def conv(y, w_ref):
            # y: (BC, S) activations for the whole block (batch stacked on sublanes).
            xe_ref[:, pad:pad + S] = y
            xp = xe_ref[...]                                  # (BC, 2*pad+S) value
            for t in range(KK):
                kh, kw = divmod(t, K)
                start = pad + (kh - p) * W + (kw - p)
                tap = xp[:, start:start + S]                  # lane-shifted window
                if kw != p:
                    tap = tap * hmask[kw]                     # kill horizontal row wrap
                col_ref[t * BC:(t + 1) * BC, :] = tap         # 8-sublane-aligned store
            # Single MXU dot per conv: (BC, KK*BC) @ (KK*BC, S) -> (BC, S).
            return jnp.dot(w_ref[...], col_ref[...],
                           preferred_element_type=jnp.float32)

        y1 = jnp.maximum(conv(x, w1_ref), 0.0)   # conv1 + ReLU; stays in VMEM
        y2 = conv(y1, w2_ref)                    # conv2
        out_ref[...] = (y2 + x).astype(out_ref.dtype)         # residual; (8,256) dense

    return kernel


@jax.jit
def fb_forward(x_nchw, w1, w2):
    """FB.forward: conv -> ReLU -> conv -> (+x).

    x_nchw : (N, C, H, W) float32
    w1, w2 : (C_out, C_in, K, K) float32 (PyTorch Conv2d layout), bias-free.
    """
    N, C, H, W = x_nchw.shape
    K = w1.shape[-1]
    p = K // 2
    S = H * W
    KK = K * K

    # Images per grid step: smallest count giving 8-sublane-dense blocks, packed up to
    # ~8 images per step so the demo batch is a single grid step.
    b_unit = 8 // math.gcd(8, C)
    n_units = -(-N // b_unit)
    B = b_unit * min(n_units, max(1, 8 // b_unit))
    BC = B * C
    N_pad = -(-N // B) * B

    # Flat pad per row: >= p*(W+1) so all vertical out-of-bounds taps land in zeros,
    # rounded to 128 so the interior/border lane slices are 128-aligned.
    pad = max(128, -(-(p * (W + 1)) // 128) * 128)

    x_flat = x_nchw.reshape(N, C, S)
    if N_pad != N:
        x_flat = jnp.pad(x_flat, ((0, N_pad - N), (0, 0), (0, 0)))
    x2d = x_flat.reshape(N_pad * C, S)

    def flatten_weight(w):
        # (Cout, Cin, K, K) -> block-diagonal over the B images of the step:
        #   rows [b, c_out], cols [t, b', c_in]; nonzero only when b == b'.
        wt = jnp.transpose(w, (2, 3, 0, 1)).reshape(KK, C, C)          # [t, o, i]
        big = jnp.einsum('bp,toi->botpi', jnp.eye(B, dtype=w.dtype), wt)
        return big.reshape(BC, KK * BC)

    w1f = flatten_weight(w1)
    w2f = flatten_weight(w2)

    # masks[kw, h*W+w] = 1 iff 0 <= w + (kw - p) < W  (horizontal validity per tap).
    col = jnp.arange(S, dtype=jnp.int32) % W
    masks = jnp.stack(
        [((col + dw >= 0) & (col + dw < W)).astype(jnp.float32)
         for dw in range(-p, p + 1)], axis=0)                           # (K, S)

    kernel = _make_fb_kernel(K, H, W, C, B, pad)

    out2d = pl.pallas_call(
        kernel,
        out_shape=jax.ShapeDtypeStruct((N_pad * C, S), x_nchw.dtype),
        grid_spec=pltpu.PrefetchScalarGridSpec(
            num_scalar_prefetch=0,
            grid=(N_pad // B,),
            in_specs=[
                pl.BlockSpec((BC, S), lambda i: (i, 0)),
                pl.BlockSpec((BC, KK * BC), lambda i: (0, 0)),
                pl.BlockSpec((BC, KK * BC), lambda i: (0, 0)),
                pl.BlockSpec((K, S), lambda i: (0, 0)),
            ],
            out_specs=pl.BlockSpec((BC, S), lambda i: (i, 0)),
            scratch_shapes=[
                pltpu.VMEM((BC, pad + S + pad), jnp.float32),
                pltpu.VMEM((KK * BC, S), jnp.float32),
            ],
        ),
        compiler_params=pltpu.CompilerParams(
            dimension_semantics=("arbitrary",)),
    )(x2d, w1f, w2f, masks)

    out = out2d.reshape(N_pad, C, S)[:N]
    return out.reshape(N, C, H, W)


def _reference_fb(x_nchw, w1, w2):
    """Pure-JAX reference (lax.conv) for correctness checking."""
    def conv(x, w):  # w is (Cout, Cin, K, K) == OIHW
        return jax.lax.conv_general_dilated(
            x, w, window_strides=(1, 1), padding="SAME",
            dimension_numbers=("NCHW", "OIHW", "NCHW"))
    y = jax.nn.relu(conv(x_nchw, w1))
    y = conv(y, w2)
    return y + x_nchw


if __name__ == "__main__":
    # Small shapes consistent with FB(n_feat=4, kernel_size=3): x is (N, C, H, W).
    N, C, H, W, K = 2, 4, 16, 16, 3

    key = jax.random.PRNGKey(0)
    kx, k1, k2 = jax.random.split(key, 3)

    x = jax.random.normal(kx, (N, C, H, W), dtype=jnp.float32)
    scale = 1.0 / jnp.sqrt(C * K * K)
    # PyTorch Conv2d weight layout: (C_out, C_in, K, K), bias=False.
    w1 = jax.random.normal(k1, (C, C, K, K), dtype=jnp.float32) * scale
    w2 = jax.random.normal(k2, (C, C, K, K), dtype=jnp.float32) * scale

    out = jax.block_until_ready(fb_forward(x, w1, w2))

    ref = _reference_fb(x, w1, w2)
    assert out.shape == (N, C, H, W)
    assert jnp.allclose(out, ref, atol=2e-4, rtol=2e-4), "mismatch vs reference"

    print("KERNEL_OK")
</pallas_src>

<mosaic_0001>
module attributes {stable_mosaic.version = 11 : i64} {
  func.func @kernel(%arg0: i32, %arg1: memref<8x256xf32, #tpu.memory_space<vmem>>, %arg2: memref<8x72xf32, #tpu.memory_space<vmem>>, %arg3: memref<8x72xf32, #tpu.memory_space<vmem>>, %arg4: memref<3x256xf32, #tpu.memory_space<vmem>>, %arg5: memref<8x256xf32, #tpu.memory_space<vmem>>, %arg6: memref<8x512xf32, #tpu.memory_space<vmem>>, %arg7: memref<72x256xf32, #tpu.memory_space<vmem>>) attributes {dimension_semantics = [#tpu.dimension_semantics<arbitrary>], iteration_bounds = array<i64: 1>, scalar_prefetch = 0 : i64, scratch_operands = 2 : i64, tpu.core_type = #tpu.core_type<tc>, window_params = [{transform_indices = @transform_0, window_bounds = array<i64: 8, 256>}, {pipeline_mode = #tpu.pipeline_mode<synchronous>, transform_indices = @transform_1, window_bounds = array<i64: 8, 72>}, {pipeline_mode = #tpu.pipeline_mode<synchronous>, transform_indices = @transform_2, window_bounds = array<i64: 8, 72>}, {pipeline_mode = #tpu.pipeline_mode<synchronous>, transform_indices = @transform_3, window_bounds = array<i64: 3, 256>}, {transform_indices = @transform_4, window_bounds = array<i64: 8, 256>}]} {
    %cst = arith.constant 0.000000e+00 : f32
    %0 = vector.broadcast %cst : f32 to vector<8x128xf32>
    %c0 = arith.constant 0 : index
    %c0_0 = arith.constant 0 : index
    %1 = vector.load %arg6[%c0, %c0_0] : memref<8x512xf32, #tpu.memory_space<vmem>>, vector<8x128xf32>
    tpu.vector_store %arg6[%c0, %c0_0], %0 {strides = array<i32>} : memref<8x512xf32, #tpu.memory_space<vmem>>, vector<8x128xf32>,
    %cst_1 = arith.constant 0.000000e+00 : f32
    %2 = vector.broadcast %cst_1 : f32 to vector<8x128xf32>
    %c0_2 = arith.constant 0 : index
    %c384 = arith.constant 384 : index
    %3 = vector.load %arg6[%c0_2, %c384] : memref<8x512xf32, #tpu.memory_space<vmem>>, vector<8x128xf32>
    tpu.vector_store %arg6[%c0_2, %c384], %2 {strides = array<i32>} : memref<8x512xf32, #tpu.memory_space<vmem>>, vector<8x128xf32>,
    %c0_3 = arith.constant 0 : index
    %c0_4 = arith.constant 0 : index
    %4 = vector.load %arg1[%c0_3, %c0_4] : memref<8x256xf32, #tpu.memory_space<vmem>>, vector<8x256xf32>
    %c0_5 = arith.constant 0 : index
    %c0_6 = arith.constant 0 : index
    %5 = vector.load %arg4[%c0_5, %c0_6] : memref<3x256xf32, #tpu.memory_space<vmem>>, vector<1x256xf32>
    %c2 = arith.constant 2 : index
    %c0_7 = arith.constant 0 : index
    %6 = vector.load %arg4[%c2, %c0_7] : memref<3x256xf32, #tpu.memory_space<vmem>>, vector<1x256xf32>
    %c0_8 = arith.constant 0 : index
    %c128 = arith.constant 128 : index
    %7 = vector.load %arg6[%c0_8, %c128] : memref<8x512xf32, #tpu.memory_space<vmem>>, vector<8x256xf32>
    tpu.vector_store %arg6[%c0_8, %c128], %4 {strides = array<i32>} : memref<8x512xf32, #tpu.memory_space<vmem>>, vector<8x256xf32>,
    %c0_9 = arith.constant 0 : index
    %c0_10 = arith.constant 0 : index
    %8 = vector.load %arg6[%c0_9, %c0_10] : memref<8x512xf32, #tpu.memory_space<vmem>>, vector<8x512xf32>
    %9 = vector.extract_strided_slice %8 {offsets = [0, 111], sizes = [8, 256], strides = [1, 1]} : vector<8x512xf32> to vector<8x256xf32>
    %10 = vector.broadcast %5 : vector<1x256xf32> to vector<8x256xf32>
    %11 = arith.mulf %9, %10 : vector<8x256xf32>
    %c0_11 = arith.constant 0 : index
    %c0_12 = arith.constant 0 : index
    %12 = vector.load %arg7[%c0_11, %c0_12] : memref<72x256xf32, #tpu.memory_space<vmem>>, vector<8x256xf32>
    tpu.vector_store %arg7[%c0_11, %c0_12], %11 {strides = array<i32>} : memref<72x256xf32, #tpu.memory_space<vmem>>, vector<8x256xf32>,
    %13 = vector.extract_strided_slice %8 {offsets = [0, 112], sizes = [8, 256], strides = [1, 1]} : vector<8x512xf32> to vector<8x256xf32>
    %c8 = arith.constant 8 : index
    %c0_13 = arith.constant 0 : index
    %14 = vector.load %arg7[%c8, %c0_13] : memref<72x256xf32, #tpu.memory_space<vmem>>, vector<8x256xf32>
    tpu.vector_store %arg7[%c8, %c0_13], %13 {strides = array<i32>} : memref<72x256xf32, #tpu.memory_space<vmem>>, vector<8x256xf32>,
    %15 = vector.extract_strided_slice %8 {offsets = [0, 113], sizes = [8, 256], strides = [1, 1]} : vector<8x512xf32> to vector<8x256xf32>
    %16 = vector.broadcast %6 : vector<1x256xf32> to vector<8x256xf32>
    %17 = arith.mulf %15, %16 : vector<8x256xf32>
    %c16 = arith.constant 16 : index
    %c0_14 = arith.constant 0 : index
    %18 = vector.load %arg7[%c16, %c0_14] : memref<72x256xf32, #tpu.memory_space<vmem>>, vector<8x256xf32>
    tpu.vector_store %arg7[%c16, %c0_14], %17 {strides = array<i32>} : memref<72x256xf32, #tpu.memory_space<vmem>>, vector<8x256xf32>,
    %19 = vector.extract_strided_slice %8 {offsets = [0, 127], sizes = [8, 256], strides = [1, 1]} : vector<8x512xf32> to vector<8x256xf32>
    %20 = vector.broadcast %5 : vector<1x256xf32> to vector<8x256xf32>
    %21 = arith.mulf %19, %20 : vector<8x256xf32>
    %c24 = arith.constant 24 : index
    %c0_15 = arith.constant 0 : index
    %22 = vector.load %arg7[%c24, %c0_15] : memref<72x256xf32, #tpu.memory_space<vmem>>, vector<8x256xf32>
    tpu.vector_store %arg7[%c24, %c0_15], %21 {strides = array<i32>} : memref<72x256xf32, #tpu.memory_space<vmem>>, vector<8x256xf32>,
    %23 = vector.extract_strided_slice %8 {offsets = [0, 128], sizes = [8, 256], strides = [1, 1]} : vector<8x512xf32> to vector<8x256xf32>
    %c32 = arith.constant 32 : index
    %c0_16 = arith.constant 0 : index
    %24 = vector.load %arg7[%c32, %c0_16] : memref<72x256xf32, #tpu.memory_space<vmem>>, vector<8x256xf32>
    tpu.vector_store %arg7[%c32, %c0_16], %23 {strides = array<i32>} : memref<72x256xf32, #tpu.memory_space<vmem>>, vector<8x256xf32>,
    %25 = vector.extract_strided_slice %8 {offsets = [0, 129], sizes = [8, 256], strides = [1, 1]} : vector<8x512xf32> to vector<8x256xf32>
    %26 = vector.broadcast %6 : vector<1x256xf32> to vector<8x256xf32>
    %27 = arith.mulf %25, %26 : vector<8x256xf32>
    %c40 = arith.constant 40 : index
    %c0_17 = arith.constant 0 : index
    %28 = vector.load %arg7[%c40, %c0_17] : memref<72x256xf32, #tpu.memory_space<vmem>>, vector<8x256xf32>
    tpu.vector_store %arg7[%c40, %c0_17], %27 {strides = array<i32>} : memref<72x256xf32, #tpu.memory_space<vmem>>, vector<8x256xf32>,
    %29 = vector.extract_strided_slice %8 {offsets = [0, 143], sizes = [8, 256], strides = [1, 1]} : vector<8x512xf32> to vector<8x256xf32>
    %30 = vector.broadcast %5 : vector<1x256xf32> to vector<8x256xf32>
    %31 = arith.mulf %29, %30 : vector<8x256xf32>
    %c48 = arith.constant 48 : index
    %c0_18 = arith.constant 0 : index
    %32 = vector.load %arg7[%c48, %c0_18] : memref<72x256xf32, #tpu.memory_space<vmem>>, vector<8x256xf32>
    tpu.vector_store %arg7[%c48, %c0_18], %31 {strides = array<i32>} : memref<72x256xf32, #tpu.memory_space<vmem>>, vector<8x256xf32>,
    %33 = vector.extract_strided_slice %8 {offsets = [0, 144], sizes = [8, 256], strides = [1, 1]} : vector<8x512xf32> to vector<8x256xf32>
    %c56 = arith.constant 56 : index
    %c0_19 = arith.constant 0 : index
    %34 = vector.load %arg7[%c56, %c0_19] : memref<72x256xf32, #tpu.memory_space<vmem>>, vector<8x256xf32>
    tpu.vector_store %arg7[%c56, %c0_19], %33 {strides = array<i32>} : memref<72x256xf32, #tpu.memory_space<vmem>>, vector<8x256xf32>,
    %35 = vector.extract_strided_slice %8 {offsets = [0, 145], sizes = [8, 256], strides = [1, 1]} : vector<8x512xf32> to vector<8x256xf32>
    %36 = vector.broadcast %6 : vector<1x256xf32> to vector<8x256xf32>
    %37 = arith.mulf %35, %36 : vector<8x256xf32>
    %c64 = arith.constant 64 : index
    %c0_20 = arith.constant 0 : index
    %38 = vector.load %arg7[%c64, %c0_20] : memref<72x256xf32, #tpu.memory_space<vmem>>, vector<8x256xf32>
    tpu.vector_store %arg7[%c64, %c0_20], %37 {strides = array<i32>} : memref<72x256xf32, #tpu.memory_space<vmem>>, vector<8x256xf32>,
    %c0_21 = arith.constant 0 : index
    %c0_22 = arith.constant 0 : index
    %39 = vector.load %arg2[%c0_21, %c0_22] : memref<8x72xf32, #tpu.memory_space<vmem>>, vector<8x72xf32>
    %c0_23 = arith.constant 0 : index
    %c0_24 = arith.constant 0 : index
    %40 = vector.load %arg7[%c0_23, %c0_24] : memref<72x256xf32, #tpu.memory_space<vmem>>, vector<72x256xf32>
    %cst_25 = arith.constant dense<0.000000e+00> : vector<8x256xf32>
    %41 = tpu.matmul %39, %40, %cst_25 {dimension_numbers = #tpu.dot_dimension_numbers<[1], [0], [0], [1], [0, 0, 1, 1], [], []>} : vector<8x72xf32>, vector<72x256xf32>, vector<8x256xf32> -> vector<8x256xf32>
    %cst_26 = arith.constant 0.000000e+00 : f32
    %42 = vector.broadcast %cst_26 : f32 to vector<8x256xf32>
    %43 = arith.maximumf %41, %42 : vector<8x256xf32>
    %c0_27 = arith.constant 0 : index
    %c128_28 = arith.constant 128 : index
    %44 = vector.load %arg6[%c0_27, %c128_28] : memref<8x512xf32, #tpu.memory_space<vmem>>, vector<8x256xf32>
    tpu.vector_store %arg6[%c0_27, %c128_28], %43 {strides = array<i32>} : memref<8x512xf32, #tpu.memory_space<vmem>>, vector<8x256xf32>,
    %c0_29 = arith.constant 0 : index
    %c0_30 = arith.constant 0 : index
    %45 = vector.load %arg6[%c0_29, %c0_30] : memref<8x512xf32, #tpu.memory_space<vmem>>, vector<8x512xf32>
    %46 = vector.extract_strided_slice %45 {offsets = [0, 111], sizes = [8, 256], strides = [1, 1]} : vector<8x512xf32> to vector<8x256xf32>
    %47 = vector.broadcast %5 : vector<1x256xf32> to vector<8x256xf32>
    %48 = arith.mulf %46, %47 : vector<8x256xf32>
    %c0_31 = arith.constant 0 : index
    %c0_32 = arith.constant 0 : index
    %49 = vector.load %arg7[%c0_31, %c0_32] : memref<72x256xf32, #tpu.memory_space<vmem>>, vector<8x256xf32>
    tpu.vector_store %arg7[%c0_31, %c0_32], %48 {strides = array<i32>} : memref<72x256xf32, #tpu.memory_space<vmem>>, vector<8x256xf32>,
    %50 = vector.extract_strided_slice %45 {offsets = [0, 112], sizes = [8, 256], strides = [1, 1]} : vector<8x512xf32> to vector<8x256xf32>
    %c8_33 = arith.constant 8 : index
    %c0_34 = arith.constant 0 : index
    %51 = vector.load %arg7[%c8_33, %c0_34] : memref<72x256xf32, #tpu.memory_space<vmem>>, vector<8x256xf32>
    tpu.vector_store %arg7[%c8_33, %c0_34], %50 {strides = array<i32>} : memref<72x256xf32, #tpu.memory_space<vmem>>, vector<8x256xf32>,
    %52 = vector.extract_strided_slice %45 {offsets = [0, 113], sizes = [8, 256], strides = [1, 1]} : vector<8x512xf32> to vector<8x256xf32>
    %53 = vector.broadcast %6 : vector<1x256xf32> to vector<8x256xf32>
    %54 = arith.mulf %52, %53 : vector<8x256xf32>
    %c16_35 = arith.constant 16 : index
    %c0_36 = arith.constant 0 : index
    %55 = vector.load %arg7[%c16_35, %c0_36] : memref<72x256xf32, #tpu.memory_space<vmem>>, vector<8x256xf32>
    tpu.vector_store %arg7[%c16_35, %c0_36], %54 {strides = array<i32>} : memref<72x256xf32, #tpu.memory_space<vmem>>, vector<8x256xf32>,
    %56 = vector.extract_strided_slice %45 {offsets = [0, 127], sizes = [8, 256], strides = [1, 1]} : vector<8x512xf32> to vector<8x256xf32>
    %57 = vector.broadcast %5 : vector<1x256xf32> to vector<8x256xf32>
    %58 = arith.mulf %56, %57 : vector<8x256xf32>
    %c24_37 = arith.constant 24 : index
    %c0_38 = arith.constant 0 : index
    %59 = vector.load %arg7[%c24_37, %c0_38] : memref<72x256xf32, #tpu.memory_space<vmem>>, vector<8x256xf32>
    tpu.vector_store %arg7[%c24_37, %c0_38], %58 {strides = array<i32>} : memref<72x256xf32, #tpu.memory_space<vmem>>, vector<8x256xf32>,
    %60 = vector.extract_strided_slice %45 {offsets = [0, 128], sizes = [8, 256], strides = [1, 1]} : vector<8x512xf32> to vector<8x256xf32>
    %c32_39 = arith.constant 32 : index
    %c0_40 = arith.constant 0 : index
    %61 = vector.load %arg7[%c32_39, %c0_40] : memref<72x256xf32, #tpu.memory_space<vmem>>, vector<8x256xf32>
    tpu.vector_store %arg7[%c32_39, %c0_40], %60 {strides = array<i32>} : memref<72x256xf32, #tpu.memory_space<vmem>>, vector<8x256xf32>,
    %62 = vector.extract_strided_slice %45 {offsets = [0, 129], sizes = [8, 256], strides = [1, 1]} : vector<8x512xf32> to vector<8x256xf32>
    %63 = vector.broadcast %6 : vector<1x256xf32> to vector<8x256xf32>
    %64 = arith.mulf %62, %63 : vector<8x256xf32>
    %c40_41 = arith.constant 40 : index
    %c0_42 = arith.constant 0 : index
    %65 = vector.load %arg7[%c40_41, %c0_42] : memref<72x256xf32, #tpu.memory_space<vmem>>, vector<8x256xf32>
    tpu.vector_store %arg7[%c40_41, %c0_42], %64 {strides = array<i32>} : memref<72x256xf32, #tpu.memory_space<vmem>>, vector<8x256xf32>,
    %66 = vector.extract_strided_slice %45 {offsets = [0, 143], sizes = [8, 256], strides = [1, 1]} : vector<8x512xf32> to vector<8x256xf32>
    %67 = vector.broadcast %5 : vector<1x256xf32> to vector<8x256xf32>
    %68 = arith.mulf %66, %67 : vector<8x256xf32>
    %c48_43 = arith.constant 48 : index
    %c0_44 = arith.constant 0 : index
    %69 = vector.load %arg7[%c48_43, %c0_44] : memref<72x256xf32, #tpu.memory_space<vmem>>, vector<8x256xf32>
    tpu.vector_store %arg7[%c48_43, %c0_44], %68 {strides = array<i32>} : memref<72x256xf32, #tpu.memory_space<vmem>>, vector<8x256xf32>,
    %70 = vector.extract_strided_slice %45 {offsets = [0, 144], sizes = [8, 256], strides = [1, 1]} : vector<8x512xf32> to vector<8x256xf32>
    %c56_45 = arith.constant 56 : index
    %c0_46 = arith.constant 0 : index
    %71 = vector.load %arg7[%c56_45, %c0_46] : memref<72x256xf32, #tpu.memory_space<vmem>>, vector<8x256xf32>
    tpu.vector_store %arg7[%c56_45, %c0_46], %70 {strides = array<i32>} : memref<72x256xf32, #tpu.memory_space<vmem>>, vector<8x256xf32>,
    %72 = vector.extract_strided_slice %45 {offsets = [0, 145], sizes = [8, 256], strides = [1, 1]} : vector<8x512xf32> to vector<8x256xf32>
    %73 = vector.broadcast %6 : vector<1x256xf32> to vector<8x256xf32>
    %74 = arith.mulf %72, %73 : vector<8x256xf32>
    %c64_47 = arith.constant 64 : index
    %c0_48 = arith.constant 0 : index
    %75 = vector.load %arg7[%c64_47, %c0_48] : memref<72x256xf32, #tpu.memory_space<vmem>>, vector<8x256xf32>
    tpu.vector_store %arg7[%c64_47, %c0_48], %74 {strides = array<i32>} : memref<72x256xf32, #tpu.memory_space<vmem>>, vector<8x256xf32>,
    %c0_49 = arith.constant 0 : index
    %c0_50 = arith.constant 0 : index
    %76 = vector.load %arg3[%c0_49, %c0_50] : memref<8x72xf32, #tpu.memory_space<vmem>>, vector<8x72xf32>
    %c0_51 = arith.constant 0 : index
    %c0_52 = arith.constant 0 : index
    %77 = vector.load %arg7[%c0_51, %c0_52] : memref<72x256xf32, #tpu.memory_space<vmem>>, vector<72x256xf32>
    %cst_53 = arith.constant dense<0.000000e+00> : vector<8x256xf32>
    %78 = tpu.matmul %76, %77, %cst_53 {dimension_numbers = #tpu.dot_dimension_numbers<[1], [0], [0], [1], [0, 0, 1, 1], [], []>} : vector<8x72xf32>, vector<72x256xf32>, vector<8x256xf32> -> vector<8x256xf32>
    %79 = arith.addf %78, %4 : vector<8x256xf32>
    %c0_54 = arith.constant 0 : index
    %c0_55 = arith.constant 0 : index
    %80 = vector.load %arg5[%c0_54, %c0_55] : memref<8x256xf32, #tpu.memory_space<vmem>>, vector<8x256xf32>
    tpu.vector_store %arg5[%c0_54, %c0_55], %79 {strides = array<i32>} : memref<8x256xf32, #tpu.memory_space<vmem>>, vector<8x256xf32>,
    return
  }
  func.func @transform_0(%arg0: i32) -> (i32, i32) {
    %c0_i32 = arith.constant 0 : i32
    %c0_i32_0 = arith.constant 0 : i32
    return %arg0, %c0_i32 : i32, i32
  }
  func.func @transform_1(%arg0: i32) -> (i32, i32) {
    %c0_i32 = arith.constant 0 : i32
    %c0_i32_0 = arith.constant 0 : i32
    %c0_i32_1 = arith.constant 0 : i32
    return %c0_i32, %c0_i32_0 : i32, i32
  }
  func.func @transform_2(%arg0: i32) -> (i32, i32) {
    %c0_i32 = arith.constant 0 : i32
    %c0_i32_0 = arith.constant 0 : i32
    %c0_i32_1 = arith.constant 0 : i32
    return %c0_i32, %c0_i32_0 : i32, i32
  }
  func.func @transform_3(%arg0: i32) -> (i32, i32) {
    %c0_i32 = arith.constant 0 : i32
    %c0_i32_0 = arith.constant 0 : i32
    %c0_i32_1 = arith.constant 0 : i32
    return %c0_i32, %c0_i32_0 : i32, i32
  }
  func.func @transform_4(%arg0: i32) -> (i32, i32) {
    %c0_i32 = arith.constant 0 : i32
    %c0_i32_0 = arith.constant 0 : i32
    return %arg0, %c0_i32 : i32, i32
  }
}

</mosaic_0001>

<bundles_post_ra>
// kernel: fb_forward.1
= control target key start
LH: loop header
LB: loop body
LE: loop exit
PB: predicated region body
PF: predicated region fallthrough
CT: control target
= control target key end

     0   :  { %v31_v0 = vlaneseq  ;;  %v593_v1 = vmov 0.0   ;;  %s594_s19 = smov 17   ;;  %s595_s20 = smov 15   ;;  %vm60_vm0 = vcmask 138240   ;;  %vm113_vm1 = vcmask 121856   ;;  %s861_s3 = inlined_call_operand.vmem [shape: f32[3,256], index: 3, kind: input, shape index: {}]   ;;  %s862_s0 = inlined_call_operand.vmem [shape: f32[8,256], index: 0, kind: input, shape index: {}]   ;;  %s863_s1 = inlined_call_operand.vmem [shape: f32[8,72], index: 1, kind: input, shape index: {}]   ;;  %s864_s2 = inlined_call_operand.vmem [shape: f32[8,72], index: 2, kind: input, shape index: {}]   ;;  %s865_s4 = inlined_call_operand.vmem [shape: f32[8,256], index: 4, kind: output, shape index: {}]  }
   0x1   :  { %329 = vmatprep.mubr.f32.mxu0 %v593_v1  ;;  %568 = vmatprep.mubr.f32.mxu1 %v593_v1  ;;  %v581_v3 = vld [vmem:[%s861_s3 + $0x2] ss:$4 sm:$0x3]  ;;  %v21_v4 = vld [vmem:[%s861_s3] ss:$4 sm:$0x3] }
   0x2   :  { %v32_v2 = vshrl.u32 %v31_v0, 7  ;;  %s596_s21 = smov 1   ;;  %s597_s3 = smov 127   ;;  %v650_v11 = vld [vmem:[%s862_s0 + $0x8] sm:$0xff]  ;;  %v659_v12 = vld [vmem:[%s862_s0] sm:$0xff]  ;;  %vm141_vm2 = vcmask 7168  }
   0x3   :  { %s598_s22 = smov 113   ;;  %s599_s23 = smov 111   ;;  %vm124_vm3 = vcmask 1039360   ;;  %vm96_vm4 = vcmask 924672   ;;  %vm43_vm5 = vcmask 908288   ;;  %vm209_vm6 = vcmask 916480  }
   0x4   :  { %v33_v5 = vsub.s32 0, %v32_v2  ;;  %v37_v6 = vsub.s32 1, %v32_v2  ;;  %s600_s26 = smov 112   ;;  %s601_s29 = smov 16   ;;  %vm76_vm7 = vcmask 130048   ;;  %vm261_vm8 = vcmask 588800  }
   0x6   :  { %v87_v7 = vrot.slane %v581_v3, %v33_v5  ;;  %v34_v8 = vrot.slane %v21_v4, %v33_v5  ;;  %v91_v9 = vrot.slane %v581_v3, %v37_v6  ;;  %v38_v10 = vrot.slane %v21_v4, %v37_v6 }
   0x8   :  { %216 = vrot.lane.b32.xlu0 %v87_v7, %s594_s19  ;;  %176 = vrot.lane.b32.xlu1 %v34_v8, %s595_s20 }
   0xc   :  { %218 = vrot.lane.b32.xlu0 %v91_v9, %s594_s19  ;;  %178 = vrot.lane.b32.xlu1 %v38_v10, %s595_s20 }
  0x10   :  { %150 = vrot.lane.b32.xlu0 %v87_v7, %s596_s21  ;;  %152 = vrot.lane.b32.xlu1 %v91_v9, %s596_s21 }
  0x14   :  { %120 = vrot.lane.b32.xlu0 %v34_v8, %s597_s3  ;;  %122 = vrot.lane.b32.xlu1 %v38_v10, %s597_s3 }
  0x18   :  { %92 = vrot.lane.b32.xlu0 %v87_v7, %s598_s22  ;;  %94 = vrot.lane.b32.xlu1 %v91_v9, %s598_s22 }
  0x1c   :  { %39 = vrot.lane.b32.xlu0 %v34_v8, %s599_s23  ;;  %41 = vrot.lane.b32.xlu1 %v38_v10, %s599_s23 }
  0x20   :  { %205 = vrot.lane.b32.xlu1 %v650_v11, %s600_s26  ;;  %207 = vrot.lane.b32.xlu0 %v593_v1, %s600_s26 }
  0x24   :  { %203 = vrot.lane.b32.xlu1 %v659_v12, %s600_s26  ;;  %72 = vrot.lane.b32.xlu0 %v659_v12, %s601_s29 }
  0x28   :  { %74 = vrot.lane.b32.xlu1 %v650_v11, %s601_s29 }
  0x7a   :  { %v667_v13 = vpop.permute.xlu0 %216  ;;  %v669_v14 = vpop.permute.xlu1 %176 }
  0x7b   :  { %v224_v15 = vmul.f32 %v667_v13, %v659_v12  ;;  %v184_v18 = vmul.f32 %v669_v14, %v659_v12 }
  0x7d   :  { %230 = vrot.lane.b32.xlu0 %v224_v15, %s599_s23 }
  0x7e   :  { %v219_v16 = vpop.permute.xlu0 %218  ;;  %v179_v17 = vpop.permute.xlu1 %178 }
  0x7f   :  { %v226_v19 = vmul.f32 0.0, %v219_v16  ;;  %v186_v22 = vmul.f32 0.0, %v179_v17  ;;  %v696_v31 = vsel %vm60_vm0, %v667_v13, %v219_v16  ;;  %v704_v35 = vsel %vm113_vm1, %v669_v14, %v179_v17 }
  0x80   :  { %v225_v34 = vmul.f32 %v696_v31, %v650_v11  ;;  %v185_v37 = vmul.f32 %v704_v35, %v650_v11 }
  0x81   :  { %234 = vrot.lane.b32.xlu1 %v226_v19, %s599_s23  ;;  %190 = vrot.lane.b32.xlu0 %v184_v18, %s598_s22 }
  0x82   :  { %v678_v20 = vpop.permute.xlu0 %150  ;;  %v153_v21 = vpop.permute.xlu1 %152 }
  0x83   :  { %v160_v23 = vmul.f32 0.0, %v153_v21  ;;  %v158_v26 = vmul.f32 %v678_v20, %v659_v12  ;;  %v708_v36 = vsel %vm141_vm2, %v678_v20, %v153_v21 }
  0x84   :  { %v159_v38 = vmul.f32 %v708_v36, %v650_v11 }
  0x85   :  { %194 = vrot.lane.b32.xlu1 %v186_v22, %s598_s22  ;;  %168 = vrot.lane.b32.xlu0 %v160_v23, %s597_s3 }
  0x86   :  { %v121_v24 = vpop.permute.xlu0 %120  ;;  %v682_v25 = vpop.permute.xlu1 %122 }
  0x87   :  { %v129_v27 = vmul.f32 0.0, %v121_v24  ;;  %v131_v29 = vmul.f32 %v682_v25, %v650_v11  ;;  %v720_v41 = vsel %vm124_vm3, %v121_v24, %v682_v25 }
  0x88   :  { %v130_v44 = vmul.f32 %v720_v41, %v659_v12 }
  0x89   :  { %135 = vrot.lane.b32.xlu0 %v129_v27, %s596_s21  ;;  %164 = vrot.lane.b32.xlu1 %v158_v26, %s597_s3 }
  0x8a   :  { %v688_v28 = vpop.permute.xlu1 %94  ;;  %v93_v32 = vpop.permute.xlu0 %92 }
  0x8b   :  { %v103_v30 = vmul.f32 %v688_v28, %v650_v11  ;;  %v101_v33 = vmul.f32 0.0, %v93_v32  ;;  %v724_v42 = vsel %vm96_vm4, %v93_v32, %v688_v28 }
  0x8c   :  { %v102_v45 = vmul.f32 %v724_v42, %v659_v12 }
  0x8d   :  { %111 = vrot.lane.b32.xlu0 %v103_v30, %s595_s20  ;;  %139 = vrot.lane.b32.xlu1 %v131_v29, %s596_s21 }
  0x8e   :  { %v40_v39 = vpop.permute.xlu0 %39  ;;  %v716_v40 = vpop.permute.xlu1 %41 }
  0x8f   :  { %v730_v43 = vsel %vm43_vm5, %v40_v39, %v716_v40  ;;  %v743_v47 = vmul.f32 0.0, %v40_v39  ;;  %v50_v48 = vmul.f32 %v716_v40, %v650_v11 }
  0x90   :  { %v49_v46 = vmul.f32 %v730_v43, %v659_v12 }
  0x91   :  { %232 = vrot.lane.b32.xlu0 %v225_v34, %s599_s23  ;;  %107 = vrot.lane.b32.xlu1 %v101_v33, %s595_s20  ;;  %v242_v34 = vld [vmem:[%s863_s1] sm:$0xff] }
  0x92   :  { %v206_v49 = vpop.permute.xlu1 %205  ;;  %v208_v50 = vpop.permute.xlu0 %207 }
  0x93   :  { %v211_v4 = vsel %vm209_vm6, %v206_v49, %v208_v50 }
  0x95   :  { %192 = vrot.lane.b32.xlu0 %v185_v37, %s598_s22  ;;  %166 = vrot.lane.b32.xlu1 %v159_v38, %s597_s3 }
  0x96   :  { %v204_v51 = vpop.permute.xlu1 %203  ;;  %v73_v52 = vpop.permute.xlu0 %72 }
  0x97   :  { %v210_v7 = vsel %vm209_vm6, %v204_v51, %v206_v49 }
  0x99   :  { %137 = vrot.lane.b32.xlu0 %v130_v44, %s596_s21  ;;  %109 = vrot.lane.b32.xlu1 %v102_v45, %s595_s20 }
  0x9a   :  { %v75_v53 = vpop.permute.xlu1 %74 }
  0x9b   :  { %v78_v26 = vsel %vm76_vm7, %v73_v52, %v75_v53 }
  0x9d   :  { %70 = vrot.lane.b32.xlu0 %v593_v1, %s601_s29  ;;  %56 = vrot.lane.b32.xlu1 %v49_v46, %s594_s19 }
  0xa1   :  { %58 = vrot.lane.b32.xlu0 %v50_v48, %s594_s19  ;;  %54 = vrot.lane.b32.xlu1 %v743_v47, %s594_s19 }
  0xa5   :  { %456 = vrot.lane.b32.xlu0 %v593_v1, %s600_s26  ;;  %474 = vrot.lane.b32.xlu1 %v226_v19, %s599_s23 }
  0xa9   :  { %425 = vrot.lane.b32.xlu0 %v160_v23, %s597_s3  ;;  %443 = vrot.lane.b32.xlu1 %v186_v22, %s598_s22 }
  0xad   :  { %401 = vrot.lane.b32.xlu0 %v129_v27, %s596_s21  ;;  %383 = vrot.lane.b32.xlu1 %v101_v33, %s595_s20 }
  0xef   :  { %v231_v54 = vpop.permute.xlu0 %230 }
  0xf3   :  { %v235_v55 = vpop.permute.xlu1 %234  ;;  %v191_v56 = vpop.permute.xlu0 %190 }
  0xf7   :  { %v195_v57 = vpop.permute.xlu1 %194  ;;  %v169_v58 = vpop.permute.xlu0 %168 }
  0xfb   :  { %v136_v59 = vpop.permute.xlu0 %135  ;;  %v165_v60 = vpop.permute.xlu1 %164 }
  0xff   :  { %v112_v61 = vpop.permute.xlu0 %111  ;;  %v140_v62 = vpop.permute.xlu1 %139 }
 0x103   :  { %v233_v63 = vpop.permute.xlu0 %232  ;;  %v108_v0 = vpop.permute.xlu1 %107 }
 0x104   :  { %v237_v2 = vsel %vm43_vm5, %v233_v63, %v235_v55  ;;  %v236_v3 = vsel %vm43_vm5, %v231_v54, %v233_v63 }
 0x105   :  { %279 = vmatprep.subr.mxu0 %v237_v2 }
 0x106   :  { %280 = vmatpush1.msra.mxu0 %v236_v3 }
 0x107   :  { %281 = vmatprep.subr.mxu0 %v211_v4  ;;  %v193_v5 = vpop.permute.xlu0 %192  ;;  %v167_v6 = vpop.permute.xlu1 %166 }
 0x108   :  { %282 = vmatpush1.msra.mxu0 %v210_v7  ;;  %v197_v8 = vsel %vm96_vm4, %v193_v5, %v195_v57  ;;  %v196_v9 = vsel %vm96_vm4, %v191_v56, %v193_v5  ;;  %v171_v10 = vsel %vm124_vm3, %v167_v6, %v169_v58  ;;  %v170_v17 = vsel %vm124_vm3, %v165_v60, %v167_v6 }
 0x109   :  { %283 = vmatprep.subr.mxu0 %v197_v8 }
 0x10a   :  { %284 = vmatpush1.msra.mxu0 %v196_v9 }
 0x10b   :  { %285 = vmatprep.subr.mxu0 %v171_v10  ;;  %v138_v15 = vpop.permute.xlu0 %137  ;;  %v110_v16 = vpop.permute.xlu1 %109 }
 0x10c   :  { %286 = vmatpush1.msra.mxu0 %v170_v17  ;;  %v143_v18 = vsel %vm141_vm2, %v138_v15, %v140_v62  ;;  %v142_v22 = vsel %vm141_vm2, %v136_v59, %v138_v15  ;;  %v115_v23 = vsel %vm113_vm1, %v110_v16, %v112_v61  ;;  %v114_v24 = vsel %vm113_vm1, %v108_v0, %v110_v16 }
 0x10d   :  { %287 = vmatprep.subr.mxu0 %v650_v11 }
 0x10e   :  { %288 = vmatpush1.msra.mxu0 %v659_v12 }
 0x10f   :  { %289 = vmatprep.subr.mxu0 %v143_v18  ;;  %v71_v19 = vpop.permute.xlu0 %70  ;;  %v57_v21 = vpop.permute.xlu1 %56 }
 0x110   :  { %290 = vmatpush1.msra.mxu0 %v142_v22  ;;  %v77_v30 = vsel %vm76_vm7, %v71_v19, %v73_v52 }
 0x111   :  { %291 = vmatprep.subr.mxu0 %v115_v23 }
 0x112   :  { %292 = vmatpush1.msra.mxu0 %v114_v24 }
 0x113   :  { %v59_v27 = vpop.permute.xlu0 %58  ;;  %293 = vmatprep.subr.mxu0 %v78_v26  ;;  %v55_v29 = vpop.permute.xlu1 %54 }
 0x114   :  { %294 = vmatpush1.msra.mxu0 %v77_v30  ;;  %v62_v32 = vsel %vm60_vm0, %v57_v21, %v59_v27  ;;  %v61_v33 = vsel %vm60_vm0, %v55_v29, %v57_v21  ;;  %v482_v27 = vld [vmem:[%s864_s2] sm:$0xff] }
 0x115   :  { %295 = vmatprep.subr.mxu0 %v62_v32 }
 0x116   :  { %296 = vmatpush1.msra.mxu0 %v61_v33 }
 0x117   :  { %582 = vmatmul.mubr.msk.f32.vlgmr.msra.gmra.mxu0 %vm261_vm8, %v242_v34 }
 0x1d7   :  { %v331_v37 = vpop.f32.mrf.mxu0 }
 0x1d8   :  { %v779_v38 = vmax.f32 %v331_v37, 0.0 }
 0x1d9   :  { %v333_v39 = vpop.f32.mrf.mxu0 }
 0x1da   :  { %367 = vrot.lane.b32.xlu0 %v779_v38, %s601_s29  ;;  %452 = vrot.lane.b32.xlu1 %v779_v38, %s600_s26  ;;  %v785_v44 = vmax.f32 %v333_v39, 0.0  ;;  %v464_v45 = vmul.f32 %v779_v38, %v667_v13  ;;  %v433_v46 = vmul.f32 %v779_v38, %v669_v14  ;;  %v415_v48 = vmul.f32 %v779_v38, %v678_v20 }
 0x1db   :  { %v396_v49 = vmul.f32 %v779_v38, %v720_v41  ;;  %v378_v13 = vmul.f32 %v779_v38, %v724_v42 }
 0x1dc   :  { %v465_v14 = vmul.f32 %v785_v44, %v696_v31  ;;  %v434_v20 = vmul.f32 %v785_v44, %v704_v35  ;;  %v416_v41 = vmul.f32 %v785_v44, %v708_v36  ;;  %v397_v42 = vmul.f32 %v785_v44, %v682_v25  ;;  %v475_v25 = vpop.permute.xlu1 %474 }
 0x1dd   :  { %v345_v31 = vmul.f32 %v779_v38, %v730_v43  ;;  %v379_v35 = vmul.f32 %v785_v44, %v688_v28  ;;  %v346_v36 = vmul.f32 %v785_v44, %v716_v40 }
 0x1de   :  { %470 = vrot.lane.b32.xlu0 %v464_v45, %s599_s23  ;;  %454 = vrot.lane.b32.xlu1 %v785_v44, %s600_s26 }
 0x1e0   :  { %v444_v51 = vpop.permute.xlu1 %443 }
 0x1e2   :  { %439 = vrot.lane.b32.xlu0 %v433_v46, %s598_s22  ;;  %421 = vrot.lane.b32.xlu1 %v415_v48, %s597_s3 }
 0x1e4   :  { %v384_v52 = vpop.permute.xlu1 %383 }
 0x1e6   :  { %403 = vrot.lane.b32.xlu0 %v396_v49, %s596_s21  ;;  %385 = vrot.lane.b32.xlu1 %v378_v13, %s595_s20 }
 0x1ea   :  { %369 = vrot.lane.b32.xlu1 %v785_v44, %s601_s29  ;;  %472 = vrot.lane.b32.xlu0 %v465_v14, %s599_s23 }
 0x1ee   :  { %441 = vrot.lane.b32.xlu0 %v434_v20, %s598_s22  ;;  %423 = vrot.lane.b32.xlu1 %v416_v41, %s597_s3 }
 0x1f2   :  { %365 = vrot.lane.b32.xlu0 %v593_v1, %s601_s29  ;;  %405 = vrot.lane.b32.xlu1 %v397_v42, %s596_s21  ;;  %v457_v1 = vpop.permute.xlu0 %456 }
 0x1f6   :  { %352 = vrot.lane.b32.xlu1 %v345_v31, %s594_s19  ;;  %387 = vrot.lane.b32.xlu0 %v379_v35, %s595_s20  ;;  %v426_v50 = vpop.permute.xlu0 %425 }
 0x1fa   :  { %350 = vrot.lane.b32.xlu1 %v743_v47, %s594_s19  ;;  %354 = vrot.lane.b32.xlu0 %v346_v36, %s594_s19  ;;  %v402_v43 = vpop.permute.xlu0 %401 }
 0x24c   :  { %v368_v53 = vpop.permute.xlu0 %367  ;;  %v453_v28 = vpop.permute.xlu1 %452 }
 0x250   :  { %v471_v54 = vpop.permute.xlu0 %470  ;;  %v455_v55 = vpop.permute.xlu1 %454 }
 0x251   :  { %v459_v62 = vsel %vm209_vm6, %v455_v55, %v457_v1  ;;  %v458_v2 = vsel %vm209_vm6, %v453_v28, %v455_v55 }
 0x254   :  { %v440_v56 = vpop.permute.xlu0 %439  ;;  %v422_v57 = vpop.permute.xlu1 %421 }
 0x258   :  { %v404_v58 = vpop.permute.xlu0 %403  ;;  %v386_v59 = vpop.permute.xlu1 %385 }
 0x259   :  { %v407_v16 = vsel %vm141_vm2, %v402_v43, %v404_v58  ;;  %v389_v18 = vsel %vm113_vm1, %v384_v52, %v386_v59 }
 0x25c   :  { %v473_v40 = vpop.permute.xlu0 %472  ;;  %v370_v60 = vpop.permute.xlu1 %369 }
 0x25d   :  { %v477_v47 = vsel %vm43_vm5, %v473_v40, %v475_v25  ;;  %v476_v61 = vsel %vm43_vm5, %v471_v54, %v473_v40  ;;  %v372_v19 = vsel %vm76_vm7, %v368_v53, %v370_v60 }
 0x25e   :  { %518 = vmatprep.subr.mxu1 %v477_v47 }
 0x25f   :  { %519 = vmatpush1.msra.mxu1 %v476_v61 }
 0x260   :  { %v442_v63 = vpop.permute.xlu0 %441  ;;  %520 = vmatprep.subr.mxu1 %v459_v62  ;;  %v424_v0 = vpop.permute.xlu1 %423 }
 0x261   :  { %521 = vmatpush1.msra.mxu1 %v458_v2  ;;  %v446_v3 = vsel %vm96_vm4, %v442_v63, %v444_v51  ;;  %v445_v4 = vsel %vm96_vm4, %v440_v56, %v442_v63  ;;  %v428_v5 = vsel %vm124_vm3, %v424_v0, %v426_v50  ;;  %v427_v8 = vsel %vm124_vm3, %v422_v57, %v424_v0 }
 0x262   :  { %522 = vmatprep.subr.mxu1 %v446_v3 }
 0x263   :  { %523 = vmatpush1.msra.mxu1 %v445_v4 }
 0x264   :  { %v366_v6 = vpop.permute.xlu0 %365  ;;  %524 = vmatprep.subr.mxu1 %v428_v5  ;;  %v406_v7 = vpop.permute.xlu1 %405 }
 0x265   :  { %525 = vmatpush1.msra.mxu1 %v427_v8  ;;  %v408_v9 = vsel %vm141_vm2, %v404_v58, %v406_v7  ;;  %v371_v23 = vsel %vm76_vm7, %v366_v6, %v368_v53 }
 0x266   :  { %526 = vmatprep.subr.mxu1 %v785_v44 }
 0x267   :  { %527 = vmatpush1.msra.mxu1 %v779_v38 }
 0x268   :  { %v388_v10 = vpop.permute.xlu0 %387  ;;  %528 = vmatprep.subr.mxu1 %v408_v9  ;;  %v353_v15 = vpop.permute.xlu1 %352 }
 0x269   :  { %529 = vmatpush1.msra.mxu1 %v407_v16  ;;  %v390_v17 = vsel %vm113_vm1, %v386_v59, %v388_v10 }
 0x26a   :  { %530 = vmatprep.subr.mxu1 %v390_v17 }
 0x26b   :  { %531 = vmatpush1.msra.mxu1 %v389_v18 }
 0x26c   :  { %v355_v21 = vpop.permute.xlu0 %354  ;;  %532 = vmatprep.subr.mxu1 %v372_v19  ;;  %v351_v22 = vpop.permute.xlu1 %350 }
 0x26d   :  { %533 = vmatpush1.msra.mxu1 %v371_v23  ;;  %v357_v24 = vsel %vm60_vm0, %v353_v15, %v355_v21  ;;  %v356_v26 = vsel %vm60_vm0, %v351_v22, %v353_v15 }
 0x26e   :  { %534 = vmatprep.subr.mxu1 %v357_v24 }
 0x26f   :  { %535 = vmatpush1.msra.mxu1 %v356_v26 }
 0x270   :  { %583 = vmatmul.mubr.msk.f32.vlgmr.msra.gmra.mxu1 %vm261_vm8, %v482_v27 }
 0x330   :  { %v570_v29 = vpop.f32.mrf.mxu1 }
 0x331   :  { %v571_v30 = vadd.f32 %v570_v29, %v659_v12 }
 0x332   :  { %v572_v32 = vpop.f32.mrf.mxu1 }
 0x333   :  { %575 = vst [vmem:[%s865_s4] sm:$0xff] %v571_v30  ;;  %v573_v33 = vadd.f32 %v572_v32, %v650_v11 }
 0x335   :  { %576 = vst [vmem:[%s865_s4 + $0x8] sm:$0xff] %v573_v33 }

</bundles_post_ra>
